<compile_context>
chip_gen: v5e
topology: v5e:2x2
jax: 0.10.0
libtpu: 0.0.40
codegen_flags: <defaults>
</compile_context>

<pallas_src>
import jax
import jax.numpy as jnp
from jax.experimental import pallas as pl
from jax.experimental.pallas import tpu as pltpu

# ---- packed-parameter slab layout (rows x 128 lanes) ------------------------
_LANES = 128
_W1_ROW = 0          # rows [0, features)      : W1  (features x 5, lane-padded)
_W2_ROW = 128        # rows [128, 128+5)       : W2  (5 x 10, lane-padded)
_W3_ROW = 256        # rows [256, 256+10)      : W3  (10 x 15, lane-padded)
_B1_ROW = 384        # row 384, cols [0,5)     : b1
_B2_ROW = 385        # row 385, cols [0,10)    : b2
_B3_ROW = 386        # row 386, cols [0,15)    : b3
_B4_ROW = 387        # row 387, col 0          : b4 (scalar)
_W4_ROW = 388        # row 388, cols [0,15)    : W4^T (15 -> 1 as a row vector)
_SLAB_ROWS = 392     # padded to a multiple of 8 sublanes


def _round_up(n, m):
    return ((n + m - 1) // m) * m


def _pack_params(params, features, dtype):
    """Pack all weights/biases into one lane-padded (392, 128) slab (1 DMA)."""
    (w1, b1), (w2, b2), (w3, b3), (w4, b4) = params
    slab = jnp.zeros((_SLAB_ROWS, _LANES), dtype)
    slab = slab.at[_W1_ROW:_W1_ROW + features, 0:5].set(w1.astype(dtype))
    slab = slab.at[_W2_ROW:_W2_ROW + 5, 0:10].set(w2.astype(dtype))
    slab = slab.at[_W3_ROW:_W3_ROW + 10, 0:15].set(w3.astype(dtype))
    slab = slab.at[_B1_ROW, 0:5].set(b1.reshape(-1).astype(dtype))
    slab = slab.at[_B2_ROW, 0:10].set(b2.reshape(-1).astype(dtype))
    slab = slab.at[_B3_ROW, 0:15].set(b3.reshape(-1).astype(dtype))
    slab = slab.at[_B4_ROW, 0].set(b4.reshape(-1)[0].astype(dtype))
    slab = slab.at[_W4_ROW, 0:15].set(w4.reshape(-1).astype(dtype))
    return slab


def _make_kernel(features):
    f = features

    def kernel(x_ref, wb_ref, o_ref):
        # x tile: (TB, features). wb_ref: packed params, resident across tiles.
        x = x_ref[...]

        # Layer 1: features -> 5 (lane-padded to 128; padded lanes stay exactly
        # zero through bias-add and ReLU, so they contribute nothing later).
        w1 = wb_ref[_W1_ROW:_W1_ROW + f, :]                       # (f, 128)
        h = jnp.dot(x.astype(w1.dtype), w1, preferred_element_type=jnp.float32)
        h = jnp.maximum(h + wb_ref[_B1_ROW:_B1_ROW + 1, :], 0.0)

        # Layer 2: 5 -> 10 (full 128-lane contraction; extra lanes are zero on
        # both sides, so the result is exact and MXU cost is identical).
        w2 = wb_ref[_W2_ROW:_W2_ROW + _LANES, :]                  # (128, 128)
        h = jnp.dot(h.astype(w2.dtype), w2, preferred_element_type=jnp.float32)
        h = jnp.maximum(h + wb_ref[_B2_ROW:_B2_ROW + 1, :], 0.0)

        # Layer 3: 10 -> 15
        w3 = wb_ref[_W3_ROW:_W3_ROW + _LANES, :]                  # (128, 128)
        h = jnp.dot(h.astype(w3.dtype), w3, preferred_element_type=jnp.float32)
        h = jnp.maximum(h + wb_ref[_B3_ROW:_B3_ROW + 1, :], 0.0)

        # Layer 4: 15 -> 1 on VPU + XLU lane reduce (skip a 4th MXU push/drain).
        w4_row = wb_ref[_W4_ROW:_W4_ROW + 1, :]                   # (1, 128)
        out = jnp.sum(h * w4_row, axis=-1, keepdims=True)         # (TB, 1)
        out = out + wb_ref[_B4_ROW:_B4_ROW + 1, 0:1]
        o_ref[...] = out.astype(o_ref.dtype)

    return kernel


def regressor_forward(x, params, *, block_rows=1024, compute_dtype=None):
    """Forward pass. Weights stored [in, out]; biases [1, out] (see init)."""
    batch, features = x.shape
    assert features <= _LANES, "packed slab layout assumes features <= 128"

    dtype = compute_dtype if compute_dtype is not None else x.dtype
    x = x.astype(dtype)
    slab = _pack_params(params, features, dtype)

    # Batch tile: sublane aligned (8 for 32-bit, 16 for packed sub-32-bit
    # dtypes), capped at block_rows.  Sized so that double-buffered x tiles,
    # the resident ~196 KiB slab and the (tile, 128) f32 intermediates fit
    # comfortably in scoped VMEM on every generation, including v7x's 64 MiB.
    align = 8 if jnp.dtype(dtype).itemsize >= 4 else 16
    tb = min(_round_up(block_rows, align), _round_up(batch, align))
    padded = _round_up(batch, tb)
    if padded != batch:
        x = jnp.pad(x, ((0, padded - batch), (0, 0)))
    grid = (padded // tb,)

    out = pl.pallas_call(
        _make_kernel(features),
        out_shape=jax.ShapeDtypeStruct((padded, 1), jnp.float32),
        grid_spec=pltpu.PrefetchScalarGridSpec(
            num_scalar_prefetch=0,
            grid=grid,
            in_specs=[
                # x: one batch tile per grid step (software-pipelined).
                pl.BlockSpec((tb, features), lambda i: (i, 0)),
                # packed params: constant block index -> fetched once, resident.
                pl.BlockSpec((_SLAB_ROWS, _LANES), lambda i: (0, 0)),
            ],
            out_specs=pl.BlockSpec((tb, 1), lambda i: (i, 0)),
        ),
        compiler_params=pltpu.CompilerParams(
            # Batch tiles are independent -> shard across v7x's 2 TensorCores.
            dimension_semantics=("parallel",),
            vmem_limit_bytes=32 * 1024 * 1024,
        ),
    )(x, slab)
    return out[:batch]


def init_params(key, features):
    """Deterministic init mimicking nn.Linear's U(-1/sqrt(in), 1/sqrt(in))."""
    dims = [(features, 5), (5, 10), (10, 15), (15, 1)]
    params = []
    for fan_in, fan_out in dims:
        key, kw, kb = jax.random.split(key, 3)
        bound = 1.0 / jnp.sqrt(jnp.float32(fan_in))
        w = jax.random.uniform(kw, (fan_in, fan_out), jnp.float32, -bound, bound)
        b = jax.random.uniform(kb, (1, fan_out), jnp.float32, -bound, bound)
        params.append((w, b))
    return params


def _reference(x, params):
    h = x.astype(jnp.float32)
    for i, (w, b) in enumerate(params):
        h = h @ w + b.reshape(1, -1)
        if i < 3:
            h = jnp.maximum(h, 0.0)
    return h


if __name__ == "__main__":
    features = 8

    key = jax.random.PRNGKey(0)
    key, kx = jax.random.split(key)
    params = init_params(key, features)

    # 1) Small batch: single tile, single grid step.
    x_small = jax.random.normal(kx, (8, features), jnp.float32)
    out_small = jax.block_until_ready(regressor_forward(x_small, params))
    ref_small = _reference(x_small, params)
    assert out_small.shape == (8, 1)
    assert jnp.allclose(out_small, ref_small, atol=1e-5, rtol=1e-5)

    # 2) Larger batch, non-multiple of the tile: exercises the batch grid,
    #    resident-weight reuse, and the padding/slice path.
    key, kx2 = jax.random.split(key)
    x_big = jax.random.normal(kx2, (1000, features), jnp.float32)
    out_big = jax.block_until_ready(
        regressor_forward(x_big, params, block_rows=256))
    ref_big = _reference(x_big, params)
    assert out_big.shape == (1000, 1)
    assert jnp.allclose(out_big, ref_big, atol=1e-5, rtol=1e-5)

    # 3) bf16 compute path (halves batch-scaling HBM traffic; f32 accumulate).
    out_bf16 = jax.block_until_ready(
        regressor_forward(x_big, params, block_rows=256,
                          compute_dtype=jnp.bfloat16))
    assert out_bf16.shape == (1000, 1)
    assert jnp.allclose(out_bf16, ref_big, atol=0.1, rtol=0.1)

    print("KERNEL_OK")
</pallas_src>

<mosaic_0001>
module attributes {stable_mosaic.version = 11 : i64} {
  func.func @kernel(%arg0: i32, %arg1: memref<8x8xf32, #tpu.memory_space<vmem>>, %arg2: memref<392x128xf32, #tpu.memory_space<vmem>>, %arg3: memref<8x1xf32, #tpu.memory_space<vmem>>) attributes {dimension_semantics = [#tpu.dimension_semantics<parallel>], iteration_bounds = array<i64: 1>, scalar_prefetch = 0 : i64, scratch_operands = 0 : i64, tpu.core_type = #tpu.core_type<tc>, window_params = [{transform_indices = @transform_0, window_bounds = array<i64: 8, 8>}, {pipeline_mode = #tpu.pipeline_mode<synchronous>, transform_indices = @transform_1, window_bounds = array<i64: 392, 128>}, {transform_indices = @transform_2, window_bounds = array<i64: 8, 1>}]} {
    %c0 = arith.constant 0 : index
    %c0_0 = arith.constant 0 : index
    %0 = vector.load %arg1[%c0, %c0_0] : memref<8x8xf32, #tpu.memory_space<vmem>>, vector<8x8xf32>
    %c0_1 = arith.constant 0 : index
    %c0_2 = arith.constant 0 : index
    %1 = vector.load %arg2[%c0_1, %c0_2] : memref<392x128xf32, #tpu.memory_space<vmem>>, vector<8x128xf32>
    %cst = arith.constant dense<0.000000e+00> : vector<8x128xf32>
    %2 = tpu.matmul %0, %1, %cst {dimension_numbers = #tpu.dot_dimension_numbers<[1], [0], [0], [1], [0, 0, 1, 1], [], []>} : vector<8x8xf32>, vector<8x128xf32>, vector<8x128xf32> -> vector<8x128xf32>
    %c384 = arith.constant 384 : index
    %c0_3 = arith.constant 0 : index
    %3 = vector.load %arg2[%c384, %c0_3] : memref<392x128xf32, #tpu.memory_space<vmem>>, vector<1x128xf32>
    %4 = vector.broadcast %3 : vector<1x128xf32> to vector<8x128xf32>
    %5 = arith.addf %2, %4 : vector<8x128xf32>
    %cst_4 = arith.constant 0.000000e+00 : f32
    %6 = vector.broadcast %cst_4 : f32 to vector<8x128xf32>
    %7 = arith.maximumf %5, %6 : vector<8x128xf32>
    %c128 = arith.constant 128 : index
    %c0_5 = arith.constant 0 : index
    %8 = vector.load %arg2[%c128, %c0_5] : memref<392x128xf32, #tpu.memory_space<vmem>>, vector<128x128xf32>
    %cst_6 = arith.constant dense<0.000000e+00> : vector<8x128xf32>
    %9 = tpu.matmul %7, %8, %cst_6 {dimension_numbers = #tpu.dot_dimension_numbers<[1], [0], [0], [1], [0, 0, 1, 1], [], []>} : vector<8x128xf32>, vector<128x128xf32>, vector<8x128xf32> -> vector<8x128xf32>
    %c385 = arith.constant 385 : index
    %c0_7 = arith.constant 0 : index
    %10 = vector.load %arg2[%c385, %c0_7] : memref<392x128xf32, #tpu.memory_space<vmem>>, vector<1x128xf32>
    %11 = vector.broadcast %10 : vector<1x128xf32> to vector<8x128xf32>
    %12 = arith.addf %9, %11 : vector<8x128xf32>
    %cst_8 = arith.constant 0.000000e+00 : f32
    %13 = vector.broadcast %cst_8 : f32 to vector<8x128xf32>
    %14 = arith.maximumf %12, %13 : vector<8x128xf32>
    %c256 = arith.constant 256 : index
    %c0_9 = arith.constant 0 : index
    %15 = vector.load %arg2[%c256, %c0_9] : memref<392x128xf32, #tpu.memory_space<vmem>>, vector<128x128xf32>
    %cst_10 = arith.constant dense<0.000000e+00> : vector<8x128xf32>
    %16 = tpu.matmul %14, %15, %cst_10 {dimension_numbers = #tpu.dot_dimension_numbers<[1], [0], [0], [1], [0, 0, 1, 1], [], []>} : vector<8x128xf32>, vector<128x128xf32>, vector<8x128xf32> -> vector<8x128xf32>
    %c386 = arith.constant 386 : index
    %c0_11 = arith.constant 0 : index
    %17 = vector.load %arg2[%c386, %c0_11] : memref<392x128xf32, #tpu.memory_space<vmem>>, vector<1x128xf32>
    %18 = vector.broadcast %17 : vector<1x128xf32> to vector<8x128xf32>
    %19 = arith.addf %16, %18 : vector<8x128xf32>
    %cst_12 = arith.constant 0.000000e+00 : f32
    %20 = vector.broadcast %cst_12 : f32 to vector<8x128xf32>
    %21 = arith.maximumf %19, %20 : vector<8x128xf32>
    %c388 = arith.constant 388 : index
    %c0_13 = arith.constant 0 : index
    %22 = vector.load %arg2[%c388, %c0_13] : memref<392x128xf32, #tpu.memory_space<vmem>>, vector<1x128xf32>
    %23 = vector.broadcast %22 : vector<1x128xf32> to vector<8x128xf32>
    %24 = arith.mulf %21, %23 : vector<8x128xf32>
    %cst_14 = arith.constant dense<0.000000e+00> : vector<8xf32>
    %25 = vector.multi_reduction <add>, %24, %cst_14 [1] : vector<8x128xf32> to vector<8xf32>
    %26 = vector.shape_cast %25 : vector<8xf32> to vector<8x1xf32>
    %c387 = arith.constant 387 : index
    %c0_15 = arith.constant 0 : index
    %27 = vector.load %arg2[%c387, %c0_15] : memref<392x128xf32, #tpu.memory_space<vmem>>, vector<1x1xf32>
    %28 = vector.broadcast %27 : vector<1x1xf32> to vector<8x1xf32>
    %29 = arith.addf %26, %28 : vector<8x1xf32>
    %c0_16 = arith.constant 0 : index
    %c0_17 = arith.constant 0 : index
    %30 = vector.load %arg3[%c0_16, %c0_17] : memref<8x1xf32, #tpu.memory_space<vmem>>, vector<8x1xf32>
    tpu.vector_store %arg3[%c0_16, %c0_17], %29 {strides = array<i32>} : memref<8x1xf32, #tpu.memory_space<vmem>>, vector<8x1xf32>,
    return
  }
  func.func @transform_0(%arg0: i32) -> (i32, i32) {
    %c0_i32 = arith.constant 0 : i32
    %c0_i32_0 = arith.constant 0 : i32
    return %arg0, %c0_i32 : i32, i32
  }
  func.func @transform_1(%arg0: i32) -> (i32, i32) {
    %c0_i32 = arith.constant 0 : i32
    %c0_i32_0 = arith.constant 0 : i32
    %c0_i32_1 = arith.constant 0 : i32
    return %c0_i32, %c0_i32_0 : i32, i32
  }
  func.func @transform_2(%arg0: i32) -> (i32, i32) {
    %c0_i32 = arith.constant 0 : i32
    %c0_i32_0 = arith.constant 0 : i32
    return %arg0, %c0_i32 : i32, i32
  }
}

</mosaic_0001>

<bundles_post_ra>
// kernel: tpu_custom_call.1
= control target key start
LH: loop header
LB: loop body
LE: loop exit
PB: predicated region body
PF: predicated region fallthrough
CT: control target
= control target key end

     0   :  { %7 = vsyncpa [#allocation3], 0  ;;  %s254_s0 = inlined_call_operand.hbm [shape: f32[8,8], index: 0, kind: input, shape index: {}]   ;;  %s255_s1 = inlined_call_operand.hbm [shape: f32[392,128], index: 1, kind: input, shape index: {}]   ;;  %s256_s2 = inlined_call_operand.vmem [shape: f32[8,1], index: 2, kind: output, shape index: {}]  }
   0x1   :  { %s14_s11 = sshll.u32 %s254_s0, 4  ;;  %s15_s11 = int_to_ptr.hbm [resolvable:$true] %s14_s11 }
   0x2   :  { %8 = vsyncpa [#allocation5], 0  ;;  %s226_s12 = smov [#allocation2]   ;;  %s24_s16 = sshll.u32 %s255_s1, 4  ;;  %s25_s16 = int_to_ptr.hbm [resolvable:$true] %s24_s16 }
   0x3   :  { %s16_s13 = sshll.u32 %s226_s12, 4  ;;  %s227_s17 = smov [#allocation4]   ;;  %s17_s13 = int_to_ptr.vmem [resolvable:$true] %s16_s13 }
   0x4   :  { %19 = dma.hbm_to_vmem [thread:$0]  %s15_s11, 128, %s17_s13, [#allocation3]  }
   0x5   :  { %s26_s18 = sshll.u32 %s227_s17, 4  ;;  %s228_s19 = smov 128   ;;  %s27_s18 = int_to_ptr.vmem [resolvable:$true] %s26_s18 }
   0x6   :  { %s229_s20 = smov 8  }
   0x7   :  { %32 = dma.hbm_to_vmem [thread:$0]  %s25_s16, 6272, %s27_s18, [#allocation5], %s228_s19, %s228_s19, %s229_s20  }
   0x8   :  { %222 = dma.done.wait [#allocation3], 128  }
   0x9   :  { %223 = vsyncadd [#allocation3], 4294967168 }
   0xa   :  { %224 = dma.done.wait [#allocation5], 6272  }
   0xb   :  { %225 = vsyncadd [#allocation5], 4294961024  ;;  %vm45_vm0 = vcmask 64512   ;;  %v42_v0 = vld [vmem:[#allocation4] sm:$0xff]  ;;  %v41_v1 = vld [vmem:[#allocation2] sm:$0xff]  ;;  %vm156_vm1 = vcmask 7168  }
   0xc   :  { %v85_v2 = vld [vmem:[#allocation4 + $0xf8] sm:$0xff]  ;;  %64 = vmatpush.msra.mxu0 %v42_v0  ;;  %v84_v3 = vld [vmem:[#allocation4 + $0xf0] sm:$0xff]  ;;  %v83_v4 = vld [vmem:[#allocation4 + $0xe8] sm:$0xff] }
   0xd   :  { %88 = vmatpush.msra.mxu1 %v85_v2  ;;  %164 = vmatmul.msk.f32.vlgmr.msra.gmra.mxu0 %vm45_vm0, %v41_v1  ;;  %v82_v5 = vld [vmem:[#allocation4 + $0xe0] sm:$0xff]  ;;  %v81_v6 = vld [vmem:[#allocation4 + $0xd8] sm:$0xff]  ;;  %v80_v7 = vld [vmem:[#allocation4 + $0xd0] sm:$0xff] }
   0xe   :  { %v79_v8 = vld [vmem:[#allocation4 + $0xc8] sm:$0xff]  ;;  %v78_v9 = vld [vmem:[#allocation4 + $0xc0] sm:$0xff]  ;;  %v77_v10 = vld [vmem:[#allocation4 + $0xb8] sm:$0xff] }
   0xf   :  { %89 = vmatpush.msra.mxu1 %v84_v3  ;;  %v76_v11 = vld [vmem:[#allocation4 + $0xb0] sm:$0xff]  ;;  %v75_v12 = vld [vmem:[#allocation4 + $0xa8] sm:$0xff]  ;;  %v74_v13 = vld [vmem:[#allocation4 + $0xa0] sm:$0xff] }
  0x10   :  { %v73_v14 = vld [vmem:[#allocation4 + $0x98] sm:$0xff]  ;;  %v72_v15 = vld [vmem:[#allocation4 + $0x90] sm:$0xff]  ;;  %v71_v16 = vld [vmem:[#allocation4 + $0x88] sm:$0xff] }
  0x11   :  { %90 = vmatpush.msra.mxu1 %v83_v4  ;;  %v70_v17 = vld [vmem:[#allocation4 + $0x80] sm:$0xff]  ;;  %v124_v18 = vld [vmem:[#allocation4 + $0x178] sm:$0xff]  ;;  %v123_v19 = vld [vmem:[#allocation4 + $0x170] sm:$0xff] }
  0x12   :  { %127 = vmatpush.msra.mxu2 %v124_v18  ;;  %v122_v20 = vld [vmem:[#allocation4 + $0x168] sm:$0xff]  ;;  %v121_v21 = vld [vmem:[#allocation4 + $0x160] sm:$0xff]  ;;  %v120_v22 = vld [vmem:[#allocation4 + $0x158] sm:$0xff] }
  0x13   :  { %91 = vmatpush.msra.mxu1 %v82_v5  ;;  %v119_v23 = vld [vmem:[#allocation4 + $0x150] sm:$0xff]  ;;  %v118_v24 = vld [vmem:[#allocation4 + $0x148] sm:$0xff]  ;;  %v117_v25 = vld [vmem:[#allocation4 + $0x140] sm:$0xff] }
  0x14   :  { %128 = vmatpush.msra.mxu2 %v123_v19  ;;  %v116_v26 = vld [vmem:[#allocation4 + $0x138] sm:$0xff]  ;;  %v115_v27 = vld [vmem:[#allocation4 + $0x130] sm:$0xff]  ;;  %v114_v28 = vld [vmem:[#allocation4 + $0x128] sm:$0xff] }
  0x15   :  { %92 = vmatpush.msra.mxu1 %v81_v6  ;;  %v113_v29 = vld [vmem:[#allocation4 + $0x120] sm:$0xff]  ;;  %v112_v30 = vld [vmem:[#allocation4 + $0x118] sm:$0xff]  ;;  %v111_v35 = vld [vmem:[#allocation4 + $0x110] sm:$0xff] }
  0x16   :  { %129 = vmatpush.msra.mxu2 %v122_v20  ;;  %v169_v31 = vld [vmem:[#allocation4 + $0x180] ss:$0 sm:$0xff]  ;;  %v110_v36 = vld [vmem:[#allocation4 + $0x108] sm:$0xff]  ;;  %v170_v38 = vld [vmem:[#allocation4 + $0x181] ss:$0 sm:$0xff] }
  0x17   :  { %93 = vmatpush.msra.mxu1 %v80_v7  ;;  %v109_v37 = vld [vmem:[#allocation4 + $0x100] sm:$0xff] }
  0x18   :  { %130 = vmatpush.msra.mxu2 %v121_v21  ;;  %v171_v42 = vld [vmem:[#allocation4 + $0x182] ss:$0 sm:$0xff]  ;;  %v172_v45 = vld [vmem:[#allocation4 + $0x184] ss:$0 sm:$0xff]  ;;  %v173_v48 = vld [vmem:[#allocation4 + $0x183] ss:$0 sm:$0xff] }
  0x19   :  { %94 = vmatpush.msra.mxu1 %v79_v8 }
  0x1a   :  { %131 = vmatpush.msra.mxu2 %v120_v22 }
  0x1b   :  { %95 = vmatpush.msra.mxu1 %v78_v9 }
  0x1c   :  { %132 = vmatpush.msra.mxu2 %v119_v23 }
  0x1d   :  { %96 = vmatpush.msra.mxu1 %v77_v10 }
  0x1e   :  { %133 = vmatpush.msra.mxu2 %v118_v24 }
  0x1f   :  { %97 = vmatpush.msra.mxu1 %v76_v11 }
  0x20   :  { %134 = vmatpush.msra.mxu2 %v117_v25 }
  0x21   :  { %98 = vmatpush.msra.mxu1 %v75_v12 }
  0x22   :  { %135 = vmatpush.msra.mxu2 %v116_v26 }
  0x23   :  { %99 = vmatpush.msra.mxu1 %v74_v13 }
  0x24   :  { %136 = vmatpush.msra.mxu2 %v115_v27 }
  0x25   :  { %100 = vmatpush.msra.mxu1 %v73_v14 }
  0x26   :  { %137 = vmatpush.msra.mxu2 %v114_v28 }
  0x27   :  { %101 = vmatpush.msra.mxu1 %v72_v15 }
  0x28   :  { %138 = vmatpush.msra.mxu2 %v113_v29 }
  0x29   :  { %102 = vmatpush.msra.mxu1 %v71_v16 }
  0x2a   :  { %139 = vmatpush.msra.mxu2 %v112_v30 }
  0x2b   :  { %103 = vmatpush.msra.mxu1 %v70_v17 }
  0x2c   :  { %140 = vmatpush.msra.mxu2 %v111_v35 }
  0x2e   :  { %141 = vmatpush.msra.mxu2 %v110_v36 }
  0x30   :  { %142 = vmatpush.msra.mxu2 %v109_v37 }
  0x8a   :  { %v66_v32 = vpop.f32.mrf.mxu0 }
  0x8b   :  { %v67_v33 = vadd.f32 %v169_v31, %v66_v32 }
  0x8d   :  { %v69_v34 = vmax.f32 %v67_v33, 0.0 }
  0x8f   :  { %104 = vmatmul.f32.vlgmr.msra.gmra.mxu1 %v69_v34 }
 0x10c   :  { %v105_v39 = vpop.f32.mrf.mxu1 }
 0x10d   :  { %v106_v40 = vadd.f32 %v170_v38, %v105_v39 }
 0x10f   :  { %v108_v41 = vmax.f32 %v106_v40, 0.0 }
 0x111   :  { %143 = vmatmul.f32.vlgmr.msra.gmra.mxu2 %v108_v41 }
 0x194   :  { %v144_v43 = vpop.f32.mrf.mxu2 }
 0x195   :  { %v145_v44 = vadd.f32 %v171_v42, %v144_v43 }
 0x197   :  { %v147_v46 = vmax.f32 %v145_v44, 0.0 }
 0x199   :  { %v150_v47 = vmul.f32 %v172_v45, %v147_v46 }
 0x19b   :  { %151 = vadd.xlane.f32.xlu0 %v150_v47 }
 0x20e   :  { %v152_v49 = vpop.xlane.xlu0 %151 }
 0x20f   :  { %v155_v50 = vadd.f32 %v173_v48, %v152_v49 }
 0x211   :  { %157 = vst.msk [vmem:[%s256_s2] sm:$0xff] %vm156_vm1, %v155_v50 }
 0x212   :  { %162 = vsyncpa [#allocation3], 1 }
 0x213   :  { %163 = vsyncpa [#allocation5], 1 }

</bundles_post_ra>
